<compile_context>
chip_gen: v5e
topology: v5e:2x2
jax: 0.10.0
libtpu: 0.0.40
codegen_flags: <defaults>
</compile_context>

<pallas_src>
import math

import jax
import jax.numpy as jnp
from jax.experimental import pallas as pl
from jax.experimental.pallas import tpu as pltpu  # noqa: F401  (kept for TPU-specific extensions)


def _rand_like_kernel(bits_ref, o_ref):
    """bits_ref: (1, N) uint32 random bits -> o_ref: (1, N) f32 uniform [0,1)."""
    bits = bits_ref[...]
    # Exponent trick: top 23 random bits become the mantissa of a float in
    # [1, 2), then subtract 1.0 -> uniform [0, 1).  Avoids an int->float
    # convert on the VPU (shift | or | bitcast | sub).
    mant = (bits >> jnp.uint32(9)) | jnp.uint32(0x3F800000)
    o_ref[...] = jax.lax.bitcast_convert_type(mant, jnp.float32) - 1.0


def m1_forward(x1, key):
    """Forward pass of m1: returns uniform [0,1) f32 with x1's shape.

    x1's values are never read (rand_like does not depend on them), matching
    the reference module's returned tensor.
    """
    shape = x1.shape
    n = math.prod(shape)

    # Random bits from the JAX PRNG; shaped (1, n) so the full-array block is
    # exempt from the (8, 128) divisibility rule — no host-side padding.
    bits = jax.random.bits(key, (1, n), dtype=jnp.uint32)

    out = pl.pallas_call(
        _rand_like_kernel,
        out_shape=jax.ShapeDtypeStruct((1, n), jnp.float32),
        in_specs=[pl.BlockSpec((1, n), lambda: (0, 0))],
        out_specs=pl.BlockSpec((1, n), lambda: (0, 0)),
    )(bits)

    return out.reshape(shape)


if __name__ == "__main__":
    key = jax.random.PRNGKey(0)
    kx, kr = jax.random.split(key)

    # Matches the module's x1 = torch.randn(1, 2, 2)
    x1 = jax.random.normal(kx, (1, 2, 2), dtype=jnp.float32)

    out = m1_forward(x1, kr)
    out = jax.block_until_ready(out)

    assert out.shape == (1, 2, 2)
    assert out.dtype == jnp.float32
    assert bool(jnp.all(out >= 0.0)) and bool(jnp.all(out < 1.0))
    print("KERNEL_OK")
</pallas_src>

<mosaic_0001>
module attributes {stable_mosaic.version = 11 : i64} {
  func.func @_rand_like_kernel(%arg0: memref<1x4xi32, #tpu.memory_space<vmem>>, %arg1: memref<1x4xf32, #tpu.memory_space<vmem>>) attributes {dimension_semantics = [], scalar_prefetch = 0 : i64, scratch_operands = 0 : i64, tpu.core_type = #tpu.core_type<tc>} {
    %c0 = arith.constant 0 : index
    %c0_0 = arith.constant 0 : index
    %0 = vector.load %arg0[%c0, %c0_0] : memref<1x4xi32, #tpu.memory_space<vmem>>, vector<1x4xi32>
    %c9_i32 = arith.constant 9 : i32
    %1 = vector.broadcast %c9_i32 : i32 to vector<1x4xi32>
    %2 = arith.shrui %0, %1 : vector<1x4xi32>
    %c1065353216_i32 = arith.constant 1065353216 : i32
    %3 = vector.broadcast %c1065353216_i32 : i32 to vector<1x4xi32>
    %4 = arith.ori %2, %3 : vector<1x4xi32>
    %5 = tpu.bitcast %4 : vector<1x4xi32> -> vector<1x4xf32>
    %cst = arith.constant 1.000000e+00 : f32
    %6 = vector.broadcast %cst : f32 to vector<1x4xf32>
    %7 = arith.subf %5, %6 : vector<1x4xf32>
    %c0_1 = arith.constant 0 : index
    %c0_2 = arith.constant 0 : index
    %8 = vector.load %arg1[%c0_1, %c0_2] : memref<1x4xf32, #tpu.memory_space<vmem>>, vector<1x4xf32>
    tpu.vector_store %arg1[%c0_1, %c0_2], %7 {strides = array<i32>} : memref<1x4xf32, #tpu.memory_space<vmem>>, vector<1x4xf32>,
    return
  }
}

</mosaic_0001>

<bundles_post_ra>
// kernel: tpu_custom_call.1
= control target key start
LH: loop header
LB: loop body
LE: loop exit
PB: predicated region body
PF: predicated region fallthrough
CT: control target
= control target key end

     0   :  { %6 = vsyncpa [#allocation3], 0  ;;  %s120_s0 = inlined_call_operand.hbm [shape: u32[1,4], index: 0, kind: input, shape index: {}]   ;;  %s121_s1 = inlined_call_operand.hbm [shape: f32[1,4], index: 1, kind: output, shape index: {}]  }
   0x1   :  { %7 = vsyncpa [#allocation4], 0  ;;  %s13_s8 = sshll.u32 %s120_s0, 4  ;;  %s102_s9 = smov [#allocation2]   ;;  %s14_s8 = int_to_ptr.hbm [resolvable:$true] %s13_s8 }
   0x2   :  { %s15_s10 = sshll.u32 %s102_s9, 4  ;;  %s16_s10 = int_to_ptr.vmem [resolvable:$true] %s15_s10 }
   0x3   :  { %18 = dma.hbm_to_vmem [thread:$0]  %s14_s8, 16, %s16_s10, [#allocation3]  }
   0x4   :  { %98 = dma.done.wait [#allocation3], 16  }
   0x5   :  { %99 = vsyncadd [#allocation3], 4294967280  ;;  %v23_v0 = vld [vmem:[#allocation2] sm:$0x1]  ;;  %s103_s11 = smov [#allocation5]   ;;  %s37_s15 = sshll.u32 %s121_s1, 4  ;;  %s38_s15 = int_to_ptr.hbm [resolvable:$true] %s37_s15 }
   0x6   :  { %v24_v1 = vshrl.u32 %v23_v0, 9  ;;  %s35_s12 = sshll.u32 %s103_s11, 4  ;;  %vm28_vm0 = vcmask 24576   ;;  %s36_s12 = int_to_ptr.vmem [resolvable:$true] %s35_s12 }
   0x8   :  { %v25_v2 = vor.u32 1065353216, %v24_v1 }
   0xa   :  { %v47_v3 = vadd.f32 -1.0, %v25_v2 }
   0xc   :  { %29 = vst.msk [vmem:[#allocation5] sm:$0x1] %vm28_vm0, %v47_v3 }
   0xd   :  { %40 = dma.vmem_to_hbm [thread:$0]  %s36_s12, 16, %s38_s15, [#allocation4]  }
   0xe   :  { %100 = dma.done.wait [#allocation4], 16  }
   0xf   :  { %101 = vsyncadd [#allocation4], 4294967280 }
  0x10   :  { %45 = vsyncpa [#allocation3], 1 }
  0x11   :  { %46 = vsyncpa [#allocation4], 1 }

</bundles_post_ra>
